<compile_context>
chip_gen: v7x
topology: tpu7x:2x2x1
jax: 0.10.0
libtpu: 0.0.40
codegen_flags: <defaults>
</compile_context>

<pallas_src>
import jax
import jax.numpy as jnp
import numpy as np
from jax import lax
from jax.experimental import pallas as pl
from jax.experimental.pallas import tpu as pltpu


def _round_up(x, m):
    return (x + m - 1) // m * m


def _lstm_recurrence_kernel(maxlen_ref, gin_ref, len_ref, whh_hbm, out_ref,
                            w_sc, w_sem, h_sc, c_sc):
    """Grid = (batch_blocks [parallel], time_chunks [arbitrary]).

    One grid step == T LSTM timesteps for one batch block.

    maxlen_ref: (1,)        int32  SMEM (scalar-prefetched max(lengths))
    gin_ref   : (T, Bb, 4H) bf16   precomputed x_t @ W_ih^T + b (order i,f,o,g)
    len_ref   : (Bb, 1)     int32  per-row sequence lengths (resident block)
    whh_hbm   : (H, 4H)     bf16   raw HBM ref (single-buffered, loaded once)
    out_ref   : (Bb, H)     f32    final hidden state for this batch block
    """
    s = pl.program_id(1)
    T = gin_ref.shape[0]
    H = h_sc.shape[-1]

    @pl.when(s == 0)
    def _init():
        # One-time load of W_hh^T into a single (non double-buffered) VMEM
        # buffer; zero the recurrent state for this batch block.
        # TODO(synk): hide this load behind timestep 0 (h==0 needs no recurrent
        # matmul) or a cross-call DMA future; it is a ~20-40 us serial stall at
        # H=2048 on v5e/v6e.
        cp = pltpu.make_async_copy(whh_hbm, w_sc, w_sem)
        cp.start()
        cp.wait()
        h_sc[...] = jnp.zeros_like(h_sc)
        c_sc[...] = jnp.zeros_like(c_sc)

    chunk_start = s * T

    # Skip chunks in which every row is already past its length (tail padding).
    @pl.when(chunk_start < maxlen_ref[0])
    def _compute():
        w = w_sc[...]                  # (H, 4H) bf16, resident across the grid
        lens = len_ref[...]            # (Bb, 1) int32, resident

        def step(i, carry):
            h, c = carry
            gates = gin_ref[i].astype(jnp.float32) + jnp.dot(
                h.astype(w.dtype), w, preferred_element_type=jnp.float32)
            # Gate order [i, f, o | g]: one sigmoid over (Bb, 3H), one tanh
            # over (Bb, H) -> fewer, larger EUP launches.
            sig = jax.nn.sigmoid(gates[:, :3 * H])
            i_g = sig[:, 0 * H:1 * H]
            f_g = sig[:, 1 * H:2 * H]
            o_g = sig[:, 2 * H:3 * H]
            g_g = jnp.tanh(gates[:, 3 * H:4 * H])
            c_new = f_g * c + i_g * g_g
            h_new = o_g * jnp.tanh(c_new)
            # pack_padded_sequence semantics: bit-exact, NaN-safe state freeze
            # once t >= lengths[b].
            valid = (chunk_start + i) < lens          # (Bb, 1) bool
            return jnp.where(valid, h_new, h), jnp.where(valid, c_new, c)

        h, c = lax.fori_loop(0, T, step, (h_sc[...], c_sc[...]), unroll=True)
        h_sc[...] = h
        c_sc[...] = c

    @pl.when(s == pl.num_programs(1) - 1)
    def _finalize():
        out_ref[...] = h_sc[...]


def lstm_encoder_pallas(indices, lengths, word_embeddings, w_ih, w_hh,
                        b_ih, b_hh, *, batch_blocks=1, min_batch_pad=8,
                        max_steps_per_block=32, param_dtype=jnp.bfloat16):
    """Forward pass matching LSTMEncoder.forward.

    indices: (B, S) int32, lengths: (B,) int32.
    word_embeddings: (V, D) f32.
    w_ih: (4H, D), w_hh: (4H, H), b_ih/b_hh: (4H,) (PyTorch nn.LSTM layout).
    Returns (B, H) f32 final hidden states (h at t = lengths[b] - 1).

    batch_blocks: size of the leading "parallel" grid axis (set 2 on v7x with a
      large real batch so both TensorCores are used).
    min_batch_pad: minimum padded per-block batch. Production: 128 (v5e) /
      256 (v6e/v7x) so the recurrent matmul fills the MXU rows; 8 here because
      the unit test is tiny.
    """
    B, S = indices.shape
    H = w_hh.shape[1]
    G = 4 * H

    # -- gate-order permutation: PyTorch [i, f, g, o] -> kernel [i, f, o, g] --
    perm = np.concatenate([np.arange(0, H), np.arange(H, 2 * H),
                           np.arange(3 * H, 4 * H), np.arange(2 * H, 3 * H)])
    w_ih_p = w_ih[perm]
    w_hh_p = w_hh[perm]
    bias_p = (b_ih + b_hh)[perm].astype(jnp.float32)

    # -------- glue (plain XLA): embedding lookup + hoisted input projection --
    emb = jnp.take(word_embeddings, indices, axis=0)             # (B, S, D)
    x = jnp.transpose(emb, (1, 0, 2))                            # (S, B, D)
    gates_in = (jnp.einsum("sbd,gd->sbg",
                           x.astype(param_dtype), w_ih_p.astype(param_dtype),
                           preferred_element_type=jnp.float32)
                + bias_p).astype(param_dtype)                    # (S, B, 4H) bf16

    # -------- generation-aware tiling: derive T / vmem_limit from capacity ---
    NB = max(1, int(batch_blocks))
    Bb = _round_up(max(-(-B // NB), min_batch_pad), 8)           # per-block batch
    Bp = Bb * NB

    try:
        vmem_cap = int(pltpu.get_tpu_info().vmem_capacity_bytes)
    except Exception:                                            # pragma: no cover
        vmem_cap = 64 << 20                                      # conservative (v7x)
    gin_item = jnp.dtype(param_dtype).itemsize
    w_item = jnp.dtype(param_dtype).itemsize
    fixed = (H * G * w_item          # resident W_hh^T (single-buffered)
             + 2 * Bb * H * 4        # h / c state scratch
             + 2 * Bb * H * 4        # output block (conservatively x2)
             + 2 * Bb * 128 * 4)     # lane-padded lengths block
    per_step = 2 * Bb * G * gin_item  # double-buffered bf16 gate-input stream
    budget = vmem_cap - (16 << 20)    # headroom for pipeline internals
    T = int(max(1, min(max_steps_per_block, S, (budget - fixed) // per_step)))

    Sp = _round_up(S, T)
    NS = Sp // T

    gates_in = jnp.pad(gates_in, ((0, Sp - S), (0, Bp - B), (0, 0)))
    len_col = jnp.pad(lengths.astype(jnp.int32), (0, Bp - B))[:, None]  # (Bp,1)
    max_len = jnp.max(lengths).astype(jnp.int32).reshape((1,))
    whh_t = jnp.transpose(w_hh_p).astype(param_dtype)            # (H, 4H)

    vmem_needed = fixed + T * per_step
    vmem_limit = int(min(max(vmem_needed + (16 << 20), 32 << 20),
                         vmem_cap - (2 << 20)))                  # never > physical

    grid_spec = pltpu.PrefetchScalarGridSpec(
        num_scalar_prefetch=1,
        grid=(NB, NS),
        in_specs=[
            pl.BlockSpec((T, Bb, G), lambda b, s, ml: (s, b, 0)),  # gate inputs
            pl.BlockSpec((Bb, 1), lambda b, s, ml: (b, 0)),        # lengths
            pl.BlockSpec(memory_space=pl.ANY),                     # W_hh^T (HBM)
        ],
        out_specs=pl.BlockSpec((Bb, H), lambda b, s, ml: (b, 0)),
        scratch_shapes=[
            pltpu.VMEM((H, G), param_dtype),   # resident W_hh^T
            pltpu.SemaphoreType.DMA,           # weight-load semaphore
            pltpu.VMEM((Bb, H), jnp.float32),  # h state
            pltpu.VMEM((Bb, H), jnp.float32),  # c state
        ],
    )

    out_padded = pl.pallas_call(
        _lstm_recurrence_kernel,
        out_shape=jax.ShapeDtypeStruct((Bp, H), jnp.float32),
        grid_spec=grid_spec,
        compiler_params=pltpu.CompilerParams(
            dimension_semantics=("parallel", "arbitrary"),  # batch ||, time seq
            vmem_limit_bytes=vmem_limit,
        ),
    )(max_len, gates_in, len_col, whh_t)

    return out_padded[:B]


def lstm_encoder_ref(indices, lengths, word_embeddings, w_ih, w_hh, b_ih, b_hh):
    """Pure-JAX f32 reference with the same packed-sequence semantics."""
    B, S = indices.shape
    H = w_hh.shape[1]
    emb = jnp.take(word_embeddings, indices, axis=0)   # (B, S, D)
    x = jnp.transpose(emb, (1, 0, 2))                  # (S, B, D)
    bias = b_ih + b_hh

    def step(carry, inp):
        h, c = carry
        x_t, t = inp
        gates = x_t @ w_ih.T + h @ w_hh.T + bias
        i_g, f_g, g_g, o_g = jnp.split(gates, 4, axis=-1)
        i_g = jax.nn.sigmoid(i_g)
        f_g = jax.nn.sigmoid(f_g)
        g_g = jnp.tanh(g_g)
        o_g = jax.nn.sigmoid(o_g)
        c_new = f_g * c + i_g * g_g
        h_new = o_g * jnp.tanh(c_new)
        valid = (t < lengths)[:, None]
        h = jnp.where(valid, h_new, h)
        c = jnp.where(valid, c_new, c)
        return (h, c), None

    h0 = jnp.zeros((B, H), jnp.float32)
    c0 = jnp.zeros((B, H), jnp.float32)
    (h, _), _ = lax.scan(step, (h0, c0), (x, jnp.arange(S)))
    return h


if __name__ == "__main__":
    key = jax.random.PRNGKey(0)
    k_emb, k_ih, k_hh, k_bih, k_bhh, k_idx = jax.random.split(key, 6)

    vocab_size = 50
    input_dim = 32      # stand-in for 300
    hidden_dim = 32     # stand-in for 2048
    batch = 2
    seq_len = 8

    word_embeddings = jax.random.normal(k_emb, (vocab_size, input_dim), jnp.float32)
    w_ih = 0.1 * jax.random.normal(k_ih, (4 * hidden_dim, input_dim), jnp.float32)
    w_hh = 0.1 * jax.random.normal(k_hh, (4 * hidden_dim, hidden_dim), jnp.float32)
    b_ih = 0.1 * jax.random.normal(k_bih, (4 * hidden_dim,), jnp.float32)
    b_hh = 0.1 * jax.random.normal(k_bhh, (4 * hidden_dim,), jnp.float32)

    indices = jax.random.randint(k_idx, (batch, seq_len), 0, vocab_size, jnp.int32)
    lengths = jnp.array([seq_len, 5], dtype=jnp.int32)   # variable lengths

    out = lstm_encoder_pallas(indices, lengths, word_embeddings,
                              w_ih, w_hh, b_ih, b_hh)
    out = jax.block_until_ready(out)

    ref = lstm_encoder_ref(indices, lengths, word_embeddings,
                           w_ih, w_hh, b_ih, b_hh)
    # bf16 MXU operands / bf16 gate-input stream vs. pure-f32 reference.
    np.testing.assert_allclose(np.asarray(out), np.asarray(ref),
                               rtol=2e-2, atol=2e-2)
    assert out.shape == (batch, hidden_dim)
    print("KERNEL_OK")
</pallas_src>

<mosaic_0001>
module attributes {stable_mosaic.version = 11 : i64} {
  func.func @_lstm_recurrence_kernel(%arg0: i32, %arg1: i32, %arg2: memref<1xi32, #tpu.memory_space<smem>>, %arg3: memref<8x8x128xbf16, #tpu.memory_space<vmem>>, %arg4: memref<8x1xi32, #tpu.memory_space<vmem>>, %arg5: memref<32x128xbf16, #tpu.memory_space<any>>, %arg6: memref<8x32xf32, #tpu.memory_space<vmem>>, %arg7: memref<32x128xbf16, #tpu.memory_space<vmem>>, %arg8: memref<!tpu.dma_semaphore, #tpu.memory_space<semaphore_mem>>, %arg9: memref<8x32xf32, #tpu.memory_space<vmem>>, %arg10: memref<8x32xf32, #tpu.memory_space<vmem>>) attributes {dimension_semantics = [#tpu.dimension_semantics<parallel>, #tpu.dimension_semantics<arbitrary>], iteration_bounds = array<i64: 1, 1>, scalar_prefetch = 1 : i64, scratch_operands = 4 : i64, tpu.core_type = #tpu.core_type<tc>, window_params = [{transform_indices = @transform_0, window_bounds = array<i64: 8, 8, 128>}, {transform_indices = @transform_1, window_bounds = array<i64: 8, 1>}, {}, {transform_indices = @transform_3, window_bounds = array<i64: 8, 32>}]} {
    %c0_i32 = arith.constant 0 : i32
    %0 = arith.cmpi eq, %arg1, %c0_i32 : i32
    %1 = arith.extui %0 : i1 to i32
    %c0_i32_0 = arith.constant 0 : i32
    %2 = arith.cmpi ne, %1, %c0_i32_0 : i32
    scf.if %2 {
      tpu.enqueue_dma source(%arg5 : memref<32x128xbf16, #tpu.memory_space<any>>) target(%arg7 : memref<32x128xbf16, #tpu.memory_space<vmem>>) target_semaphore(%arg8 : memref<!tpu.dma_semaphore, #tpu.memory_space<semaphore_mem>>)
      tpu.wait_dma2 semaphore(%arg8 : memref<!tpu.dma_semaphore, #tpu.memory_space<semaphore_mem>>) src(%arg5 : memref<32x128xbf16, #tpu.memory_space<any>>) dst(%arg7 : memref<32x128xbf16, #tpu.memory_space<vmem>>)
      %cst = arith.constant 0.000000e+00 : f32
      %11 = vector.broadcast %cst : f32 to vector<8x32xf32>
      %c0_4 = arith.constant 0 : index
      %c0_5 = arith.constant 0 : index
      %12 = vector.load %arg9[%c0_4, %c0_5] : memref<8x32xf32, #tpu.memory_space<vmem>>, vector<8x32xf32>
      tpu.vector_store %arg9[%c0_4, %c0_5], %11 {strides = array<i32>} : memref<8x32xf32, #tpu.memory_space<vmem>>, vector<8x32xf32>,
      %cst_6 = arith.constant 0.000000e+00 : f32
      %13 = vector.broadcast %cst_6 : f32 to vector<8x32xf32>
      %c0_7 = arith.constant 0 : index
      %c0_8 = arith.constant 0 : index
      %14 = vector.load %arg10[%c0_7, %c0_8] : memref<8x32xf32, #tpu.memory_space<vmem>>, vector<8x32xf32>
      tpu.vector_store %arg10[%c0_7, %c0_8], %13 {strides = array<i32>} : memref<8x32xf32, #tpu.memory_space<vmem>>, vector<8x32xf32>,
    } else {
    }
    %c8_i32 = arith.constant 8 : i32
    %3 = arith.muli %arg1, %c8_i32 : i32
    %c0 = arith.constant 0 : index
    %4 = memref.load %arg2[%c0] : memref<1xi32, #tpu.memory_space<smem>>
    %5 = arith.cmpi slt, %3, %4 : i32
    %6 = arith.extui %5 : i1 to i32
    %c0_i32_1 = arith.constant 0 : i32
    %7 = arith.cmpi ne, %6, %c0_i32_1 : i32
    scf.if %7 {
      %c0_4 = arith.constant 0 : index
      %c0_5 = arith.constant 0 : index
      %11 = vector.load %arg7[%c0_4, %c0_5] : memref<32x128xbf16, #tpu.memory_space<vmem>>, vector<32x128xbf16>
      %c0_6 = arith.constant 0 : index
      %c0_7 = arith.constant 0 : index
      %12 = vector.load %arg4[%c0_6, %c0_7] : memref<8x1xi32, #tpu.memory_space<vmem>>, vector<8x1xi32>
      %c0_8 = arith.constant 0 : index
      %c0_9 = arith.constant 0 : index
      %13 = vector.load %arg9[%c0_8, %c0_9] : memref<8x32xf32, #tpu.memory_space<vmem>>, vector<8x32xf32>
      %c0_10 = arith.constant 0 : index
      %c0_11 = arith.constant 0 : index
      %14 = vector.load %arg10[%c0_10, %c0_11] : memref<8x32xf32, #tpu.memory_space<vmem>>, vector<8x32xf32>
      %c0_i32_12 = arith.constant 0 : i32
      %15 = arith.index_cast %c0_i32_12 : i32 to index
      %c0_13 = arith.constant 0 : index
      %c0_14 = arith.constant 0 : index
      %16 = vector.load %arg3[%15, %c0_13, %c0_14] : memref<8x8x128xbf16, #tpu.memory_space<vmem>>, vector<1x8x128xbf16>
      %17 = vector.shape_cast %16 : vector<1x8x128xbf16> to vector<8x128xbf16>
      %18 = arith.extf %17 : vector<8x128xbf16> to vector<8x128xf32>
      %19 = arith.truncf %13 : vector<8x32xf32> to vector<8x32xbf16>
      %cst = arith.constant dense<0.000000e+00> : vector<8x128xf32>
      %20 = tpu.matmul %19, %11, %cst {dimension_numbers = #tpu.dot_dimension_numbers<[1], [0], [0], [1], [0, 0, 1, 1], [], []>} : vector<8x32xbf16>, vector<32x128xbf16>, vector<8x128xf32> -> vector<8x128xf32>
      %21 = arith.addf %18, %20 : vector<8x128xf32>
      %22 = vector.extract_strided_slice %21 {offsets = [0, 0], sizes = [8, 96], strides = [1, 1]} : vector<8x128xf32> to vector<8x96xf32>
      %23 = arith.negf %22 : vector<8x96xf32>
      %24 = math.exp %23 : vector<8x96xf32>
      %cst_15 = arith.constant 1.000000e+00 : f32
      %25 = vector.broadcast %cst_15 : f32 to vector<8x96xf32>
      %26 = arith.addf %25, %24 : vector<8x96xf32>
      %27 = arith.divf %25, %26 : vector<8x96xf32>
      %28 = vector.extract_strided_slice %27 {offsets = [0, 0], sizes = [8, 32], strides = [1, 1]} : vector<8x96xf32> to vector<8x32xf32>
      %29 = vector.extract_strided_slice %27 {offsets = [0, 32], sizes = [8, 32], strides = [1, 1]} : vector<8x96xf32> to vector<8x32xf32>
      %30 = vector.extract_strided_slice %27 {offsets = [0, 64], sizes = [8, 32], strides = [1, 1]} : vector<8x96xf32> to vector<8x32xf32>
      %31 = vector.extract_strided_slice %21 {offsets = [0, 96], sizes = [8, 32], strides = [1, 1]} : vector<8x128xf32> to vector<8x32xf32>
      %32 = math.tanh %31 : vector<8x32xf32>
      %33 = arith.mulf %29, %14 : vector<8x32xf32>
      %34 = arith.mulf %28, %32 : vector<8x32xf32>
      %35 = arith.addf %33, %34 : vector<8x32xf32>
      %36 = math.tanh %35 : vector<8x32xf32>
      %37 = arith.mulf %30, %36 : vector<8x32xf32>
      %38 = arith.addi %3, %c0_i32_12 : i32
      %39 = vector.broadcast %38 : i32 to vector<8x1xi32>
      %40 = arith.cmpi slt, %39, %12 : vector<8x1xi32>
      %41 = vector.shape_cast %40 : vector<8x1xi1> to vector<8x1xi1>
      %42 = vector.broadcast %41 : vector<8x1xi1> to vector<8x32xi1>
      %43 = arith.select %42, %37, %13 : vector<8x32xi1>, vector<8x32xf32>
      %44 = vector.shape_cast %40 : vector<8x1xi1> to vector<8x1xi1>
      %45 = vector.broadcast %44 : vector<8x1xi1> to vector<8x32xi1>
      %46 = arith.select %45, %35, %14 : vector<8x32xi1>, vector<8x32xf32>
      %c1_i32 = arith.constant 1 : i32
      %47 = arith.index_cast %c1_i32 : i32 to index
      %c0_16 = arith.constant 0 : index
      %c0_17 = arith.constant 0 : index
      %48 = vector.load %arg3[%47, %c0_16, %c0_17] : memref<8x8x128xbf16, #tpu.memory_space<vmem>>, vector<1x8x128xbf16>
      %49 = vector.shape_cast %48 : vector<1x8x128xbf16> to vector<8x128xbf16>
      %50 = arith.extf %49 : vector<8x128xbf16> to vector<8x128xf32>
      %51 = arith.truncf %43 : vector<8x32xf32> to vector<8x32xbf16>
      %cst_18 = arith.constant dense<0.000000e+00> : vector<8x128xf32>
      %52 = tpu.matmul %51, %11, %cst_18 {dimension_numbers = #tpu.dot_dimension_numbers<[1], [0], [0], [1], [0, 0, 1, 1], [], []>} : vector<8x32xbf16>, vector<32x128xbf16>, vector<8x128xf32> -> vector<8x128xf32>
      %53 = arith.addf %50, %52 : vector<8x128xf32>
      %54 = vector.extract_strided_slice %53 {offsets = [0, 0], sizes = [8, 96], strides = [1, 1]} : vector<8x128xf32> to vector<8x96xf32>
      %55 = arith.negf %54 : vector<8x96xf32>
      %56 = math.exp %55 : vector<8x96xf32>
      %cst_19 = arith.constant 1.000000e+00 : f32
      %57 = vector.broadcast %cst_19 : f32 to vector<8x96xf32>
      %58 = arith.addf %57, %56 : vector<8x96xf32>
      %59 = arith.divf %57, %58 : vector<8x96xf32>
      %60 = vector.extract_strided_slice %59 {offsets = [0, 0], sizes = [8, 32], strides = [1, 1]} : vector<8x96xf32> to vector<8x32xf32>
      %61 = vector.extract_strided_slice %59 {offsets = [0, 32], sizes = [8, 32], strides = [1, 1]} : vector<8x96xf32> to vector<8x32xf32>
      %62 = vector.extract_strided_slice %59 {offsets = [0, 64], sizes = [8, 32], strides = [1, 1]} : vector<8x96xf32> to vector<8x32xf32>
      %63 = vector.extract_strided_slice %53 {offsets = [0, 96], sizes = [8, 32], strides = [1, 1]} : vector<8x128xf32> to vector<8x32xf32>
      %64 = math.tanh %63 : vector<8x32xf32>
      %65 = arith.mulf %61, %46 : vector<8x32xf32>
      %66 = arith.mulf %60, %64 : vector<8x32xf32>
      %67 = arith.addf %65, %66 : vector<8x32xf32>
      %68 = math.tanh %67 : vector<8x32xf32>
      %69 = arith.mulf %62, %68 : vector<8x32xf32>
      %70 = arith.addi %3, %c1_i32 : i32
      %71 = vector.broadcast %70 : i32 to vector<8x1xi32>
      %72 = arith.cmpi slt, %71, %12 : vector<8x1xi32>
      %73 = vector.shape_cast %72 : vector<8x1xi1> to vector<8x1xi1>
      %74 = vector.broadcast %73 : vector<8x1xi1> to vector<8x32xi1>
      %75 = arith.select %74, %69, %43 : vector<8x32xi1>, vector<8x32xf32>
      %76 = vector.shape_cast %72 : vector<8x1xi1> to vector<8x1xi1>
      %77 = vector.broadcast %76 : vector<8x1xi1> to vector<8x32xi1>
      %78 = arith.select %77, %67, %46 : vector<8x32xi1>, vector<8x32xf32>
      %c2_i32 = arith.constant 2 : i32
      %79 = arith.index_cast %c2_i32 : i32 to index
      %c0_20 = arith.constant 0 : index
      %c0_21 = arith.constant 0 : index
      %80 = vector.load %arg3[%79, %c0_20, %c0_21] : memref<8x8x128xbf16, #tpu.memory_space<vmem>>, vector<1x8x128xbf16>
      %81 = vector.shape_cast %80 : vector<1x8x128xbf16> to vector<8x128xbf16>
      %82 = arith.extf %81 : vector<8x128xbf16> to vector<8x128xf32>
      %83 = arith.truncf %75 : vector<8x32xf32> to vector<8x32xbf16>
      %cst_22 = arith.constant dense<0.000000e+00> : vector<8x128xf32>
      %84 = tpu.matmul %83, %11, %cst_22 {dimension_numbers = #tpu.dot_dimension_numbers<[1], [0], [0], [1], [0, 0, 1, 1], [], []>} : vector<8x32xbf16>, vector<32x128xbf16>, vector<8x128xf32> -> vector<8x128xf32>
      %85 = arith.addf %82, %84 : vector<8x128xf32>
      %86 = vector.extract_strided_slice %85 {offsets = [0, 0], sizes = [8, 96], strides = [1, 1]} : vector<8x128xf32> to vector<8x96xf32>
      %87 = arith.negf %86 : vector<8x96xf32>
      %88 = math.exp %87 : vector<8x96xf32>
      %cst_23 = arith.constant 1.000000e+00 : f32
      %89 = vector.broadcast %cst_23 : f32 to vector<8x96xf32>
      %90 = arith.addf %89, %88 : vector<8x96xf32>
      %91 = arith.divf %89, %90 : vector<8x96xf32>
      %92 = vector.extract_strided_slice %91 {offsets = [0, 0], sizes = [8, 32], strides = [1, 1]} : vector<8x96xf32> to vector<8x32xf32>
      %93 = vector.extract_strided_slice %91 {offsets = [0, 32], sizes = [8, 32], strides = [1, 1]} : vector<8x96xf32> to vector<8x32xf32>
      %94 = vector.extract_strided_slice %91 {offsets = [0, 64], sizes = [8, 32], strides = [1, 1]} : vector<8x96xf32> to vector<8x32xf32>
      %95 = vector.extract_strided_slice %85 {offsets = [0, 96], sizes = [8, 32], strides = [1, 1]} : vector<8x128xf32> to vector<8x32xf32>
      %96 = math.tanh %95 : vector<8x32xf32>
      %97 = arith.mulf %93, %78 : vector<8x32xf32>
      %98 = arith.mulf %92, %96 : vector<8x32xf32>
      %99 = arith.addf %97, %98 : vector<8x32xf32>
      %100 = math.tanh %99 : vector<8x32xf32>
      %101 = arith.mulf %94, %100 : vector<8x32xf32>
      %102 = arith.addi %3, %c2_i32 : i32
      %103 = vector.broadcast %102 : i32 to vector<8x1xi32>
      %104 = arith.cmpi slt, %103, %12 : vector<8x1xi32>
      %105 = vector.shape_cast %104 : vector<8x1xi1> to vector<8x1xi1>
      %106 = vector.broadcast %105 : vector<8x1xi1> to vector<8x32xi1>
      %107 = arith.select %106, %101, %75 : vector<8x32xi1>, vector<8x32xf32>
      %108 = vector.shape_cast %104 : vector<8x1xi1> to vector<8x1xi1>
      %109 = vector.broadcast %108 : vector<8x1xi1> to vector<8x32xi1>
      %110 = arith.select %109, %99, %78 : vector<8x32xi1>, vector<8x32xf32>
      %c3_i32 = arith.constant 3 : i32
      %111 = arith.index_cast %c3_i32 : i32 to index
      %c0_24 = arith.constant 0 : index
      %c0_25 = arith.constant 0 : index
      %112 = vector.load %arg3[%111, %c0_24, %c0_25] : memref<8x8x128xbf16, #tpu.memory_space<vmem>>, vector<1x8x128xbf16>
      %113 = vector.shape_cast %112 : vector<1x8x128xbf16> to vector<8x128xbf16>
      %114 = arith.extf %113 : vector<8x128xbf16> to vector<8x128xf32>
      %115 = arith.truncf %107 : vector<8x32xf32> to vector<8x32xbf16>
      %cst_26 = arith.constant dense<0.000000e+00> : vector<8x128xf32>
      %116 = tpu.matmul %115, %11, %cst_26 {dimension_numbers = #tpu.dot_dimension_numbers<[1], [0], [0], [1], [0, 0, 1, 1], [], []>} : vector<8x32xbf16>, vector<32x128xbf16>, vector<8x128xf32> -> vector<8x128xf32>
      %117 = arith.addf %114, %116 : vector<8x128xf32>
      %118 = vector.extract_strided_slice %117 {offsets = [0, 0], sizes = [8, 96], strides = [1, 1]} : vector<8x128xf32> to vector<8x96xf32>
      %119 = arith.negf %118 : vector<8x96xf32>
      %120 = math.exp %119 : vector<8x96xf32>
      %cst_27 = arith.constant 1.000000e+00 : f32
      %121 = vector.broadcast %cst_27 : f32 to vector<8x96xf32>
      %122 = arith.addf %121, %120 : vector<8x96xf32>
      %123 = arith.divf %121, %122 : vector<8x96xf32>
      %124 = vector.extract_strided_slice %123 {offsets = [0, 0], sizes = [8, 32], strides = [1, 1]} : vector<8x96xf32> to vector<8x32xf32>
      %125 = vector.extract_strided_slice %123 {offsets = [0, 32], sizes = [8, 32], strides = [1, 1]} : vector<8x96xf32> to vector<8x32xf32>
      %126 = vector.extract_strided_slice %123 {offsets = [0, 64], sizes = [8, 32], strides = [1, 1]} : vector<8x96xf32> to vector<8x32xf32>
      %127 = vector.extract_strided_slice %117 {offsets = [0, 96], sizes = [8, 32], strides = [1, 1]} : vector<8x128xf32> to vector<8x32xf32>
      %128 = math.tanh %127 : vector<8x32xf32>
      %129 = arith.mulf %125, %110 : vector<8x32xf32>
      %130 = arith.mulf %124, %128 : vector<8x32xf32>
      %131 = arith.addf %129, %130 : vector<8x32xf32>
      %132 = math.tanh %131 : vector<8x32xf32>
      %133 = arith.mulf %126, %132 : vector<8x32xf32>
      %134 = arith.addi %3, %c3_i32 : i32
      %135 = vector.broadcast %134 : i32 to vector<8x1xi32>
      %136 = arith.cmpi slt, %135, %12 : vector<8x1xi32>
      %137 = vector.shape_cast %136 : vector<8x1xi1> to vector<8x1xi1>
      %138 = vector.broadcast %137 : vector<8x1xi1> to vector<8x32xi1>
      %139 = arith.select %138, %133, %107 : vector<8x32xi1>, vector<8x32xf32>
      %140 = vector.shape_cast %136 : vector<8x1xi1> to vector<8x1xi1>
      %141 = vector.broadcast %140 : vector<8x1xi1> to vector<8x32xi1>
      %142 = arith.select %141, %131, %110 : vector<8x32xi1>, vector<8x32xf32>
      %c4_i32 = arith.constant 4 : i32
      %143 = arith.index_cast %c4_i32 : i32 to index
      %c0_28 = arith.constant 0 : index
      %c0_29 = arith.constant 0 : index
      %144 = vector.load %arg3[%143, %c0_28, %c0_29] : memref<8x8x128xbf16, #tpu.memory_space<vmem>>, vector<1x8x128xbf16>
      %145 = vector.shape_cast %144 : vector<1x8x128xbf16> to vector<8x128xbf16>
      %146 = arith.extf %145 : vector<8x128xbf16> to vector<8x128xf32>
      %147 = arith.truncf %139 : vector<8x32xf32> to vector<8x32xbf16>
      %cst_30 = arith.constant dense<0.000000e+00> : vector<8x128xf32>
      %148 = tpu.matmul %147, %11, %cst_30 {dimension_numbers = #tpu.dot_dimension_numbers<[1], [0], [0], [1], [0, 0, 1, 1], [], []>} : vector<8x32xbf16>, vector<32x128xbf16>, vector<8x128xf32> -> vector<8x128xf32>
      %149 = arith.addf %146, %148 : vector<8x128xf32>
      %150 = vector.extract_strided_slice %149 {offsets = [0, 0], sizes = [8, 96], strides = [1, 1]} : vector<8x128xf32> to vector<8x96xf32>
      %151 = arith.negf %150 : vector<8x96xf32>
      %152 = math.exp %151 : vector<8x96xf32>
      %cst_31 = arith.constant 1.000000e+00 : f32
      %153 = vector.broadcast %cst_31 : f32 to vector<8x96xf32>
      %154 = arith.addf %153, %152 : vector<8x96xf32>
      %155 = arith.divf %153, %154 : vector<8x96xf32>
      %156 = vector.extract_strided_slice %155 {offsets = [0, 0], sizes = [8, 32], strides = [1, 1]} : vector<8x96xf32> to vector<8x32xf32>
      %157 = vector.extract_strided_slice %155 {offsets = [0, 32], sizes = [8, 32], strides = [1, 1]} : vector<8x96xf32> to vector<8x32xf32>
      %158 = vector.extract_strided_slice %155 {offsets = [0, 64], sizes = [8, 32], strides = [1, 1]} : vector<8x96xf32> to vector<8x32xf32>
      %159 = vector.extract_strided_slice %149 {offsets = [0, 96], sizes = [8, 32], strides = [1, 1]} : vector<8x128xf32> to vector<8x32xf32>
      %160 = math.tanh %159 : vector<8x32xf32>
      %161 = arith.mulf %157, %142 : vector<8x32xf32>
      %162 = arith.mulf %156, %160 : vector<8x32xf32>
      %163 = arith.addf %161, %162 : vector<8x32xf32>
      %164 = math.tanh %163 : vector<8x32xf32>
      %165 = arith.mulf %158, %164 : vector<8x32xf32>
      %166 = arith.addi %3, %c4_i32 : i32
      %167 = vector.broadcast %166 : i32 to vector<8x1xi32>
      %168 = arith.cmpi slt, %167, %12 : vector<8x1xi32>
      %169 = vector.shape_cast %168 : vector<8x1xi1> to vector<8x1xi1>
      %170 = vector.broadcast %169 : vector<8x1xi1> to vector<8x32xi1>
      %171 = arith.select %170, %165, %139 : vector<8x32xi1>, vector<8x32xf32>
      %172 = vector.shape_cast %168 : vector<8x1xi1> to vector<8x1xi1>
      %173 = vector.broadcast %172 : vector<8x1xi1> to vector<8x32xi1>
      %174 = arith.select %173, %163, %142 : vector<8x32xi1>, vector<8x32xf32>
      %c5_i32 = arith.constant 5 : i32
      %175 = arith.index_cast %c5_i32 : i32 to index
      %c0_32 = arith.constant 0 : index
      %c0_33 = arith.constant 0 : index
      %176 = vector.load %arg3[%175, %c0_32, %c0_33] : memref<8x8x128xbf16, #tpu.memory_space<vmem>>, vector<1x8x128xbf16>
      %177 = vector.shape_cast %176 : vector<1x8x128xbf16> to vector<8x128xbf16>
      %178 = arith.extf %177 : vector<8x128xbf16> to vector<8x128xf32>
      %179 = arith.truncf %171 : vector<8x32xf32> to vector<8x32xbf16>
      %cst_34 = arith.constant dense<0.000000e+00> : vector<8x128xf32>
      %180 = tpu.matmul %179, %11, %cst_34 {dimension_numbers = #tpu.dot_dimension_numbers<[1], [0], [0], [1], [0, 0, 1, 1], [], []>} : vector<8x32xbf16>, vector<32x128xbf16>, vector<8x128xf32> -> vector<8x128xf32>
      %181 = arith.addf %178, %180 : vector<8x128xf32>
      %182 = vector.extract_strided_slice %181 {offsets = [0, 0], sizes = [8, 96], strides = [1, 1]} : vector<8x128xf32> to vector<8x96xf32>
      %183 = arith.negf %182 : vector<8x96xf32>
      %184 = math.exp %183 : vector<8x96xf32>
      %cst_35 = arith.constant 1.000000e+00 : f32
      %185 = vector.broadcast %cst_35 : f32 to vector<8x96xf32>
      %186 = arith.addf %185, %184 : vector<8x96xf32>
      %187 = arith.divf %185, %186 : vector<8x96xf32>
      %188 = vector.extract_strided_slice %187 {offsets = [0, 0], sizes = [8, 32], strides = [1, 1]} : vector<8x96xf32> to vector<8x32xf32>
      %189 = vector.extract_strided_slice %187 {offsets = [0, 32], sizes = [8, 32], strides = [1, 1]} : vector<8x96xf32> to vector<8x32xf32>
      %190 = vector.extract_strided_slice %187 {offsets = [0, 64], sizes = [8, 32], strides = [1, 1]} : vector<8x96xf32> to vector<8x32xf32>
      %191 = vector.extract_strided_slice %181 {offsets = [0, 96], sizes = [8, 32], strides = [1, 1]} : vector<8x128xf32> to vector<8x32xf32>
      %192 = math.tanh %191 : vector<8x32xf32>
      %193 = arith.mulf %189, %174 : vector<8x32xf32>
      %194 = arith.mulf %188, %192 : vector<8x32xf32>
      %195 = arith.addf %193, %194 : vector<8x32xf32>
      %196 = math.tanh %195 : vector<8x32xf32>
      %197 = arith.mulf %190, %196 : vector<8x32xf32>
      %198 = arith.addi %3, %c5_i32 : i32
      %199 = vector.broadcast %198 : i32 to vector<8x1xi32>
      %200 = arith.cmpi slt, %199, %12 : vector<8x1xi32>
      %201 = vector.shape_cast %200 : vector<8x1xi1> to vector<8x1xi1>
      %202 = vector.broadcast %201 : vector<8x1xi1> to vector<8x32xi1>
      %203 = arith.select %202, %197, %171 : vector<8x32xi1>, vector<8x32xf32>
      %204 = vector.shape_cast %200 : vector<8x1xi1> to vector<8x1xi1>
      %205 = vector.broadcast %204 : vector<8x1xi1> to vector<8x32xi1>
      %206 = arith.select %205, %195, %174 : vector<8x32xi1>, vector<8x32xf32>
      %c6_i32 = arith.constant 6 : i32
      %207 = arith.index_cast %c6_i32 : i32 to index
      %c0_36 = arith.constant 0 : index
      %c0_37 = arith.constant 0 : index
      %208 = vector.load %arg3[%207, %c0_36, %c0_37] : memref<8x8x128xbf16, #tpu.memory_space<vmem>>, vector<1x8x128xbf16>
      %209 = vector.shape_cast %208 : vector<1x8x128xbf16> to vector<8x128xbf16>
      %210 = arith.extf %209 : vector<8x128xbf16> to vector<8x128xf32>
      %211 = arith.truncf %203 : vector<8x32xf32> to vector<8x32xbf16>
      %cst_38 = arith.constant dense<0.000000e+00> : vector<8x128xf32>
      %212 = tpu.matmul %211, %11, %cst_38 {dimension_numbers = #tpu.dot_dimension_numbers<[1], [0], [0], [1], [0, 0, 1, 1], [], []>} : vector<8x32xbf16>, vector<32x128xbf16>, vector<8x128xf32> -> vector<8x128xf32>
      %213 = arith.addf %210, %212 : vector<8x128xf32>
      %214 = vector.extract_strided_slice %213 {offsets = [0, 0], sizes = [8, 96], strides = [1, 1]} : vector<8x128xf32> to vector<8x96xf32>
      %215 = arith.negf %214 : vector<8x96xf32>
      %216 = math.exp %215 : vector<8x96xf32>
      %cst_39 = arith.constant 1.000000e+00 : f32
      %217 = vector.broadcast %cst_39 : f32 to vector<8x96xf32>
      %218 = arith.addf %217, %216 : vector<8x96xf32>
      %219 = arith.divf %217, %218 : vector<8x96xf32>
      %220 = vector.extract_strided_slice %219 {offsets = [0, 0], sizes = [8, 32], strides = [1, 1]} : vector<8x96xf32> to vector<8x32xf32>
      %221 = vector.extract_strided_slice %219 {offsets = [0, 32], sizes = [8, 32], strides = [1, 1]} : vector<8x96xf32> to vector<8x32xf32>
      %222 = vector.extract_strided_slice %219 {offsets = [0, 64], sizes = [8, 32], strides = [1, 1]} : vector<8x96xf32> to vector<8x32xf32>
      %223 = vector.extract_strided_slice %213 {offsets = [0, 96], sizes = [8, 32], strides = [1, 1]} : vector<8x128xf32> to vector<8x32xf32>
      %224 = math.tanh %223 : vector<8x32xf32>
      %225 = arith.mulf %221, %206 : vector<8x32xf32>
      %226 = arith.mulf %220, %224 : vector<8x32xf32>
      %227 = arith.addf %225, %226 : vector<8x32xf32>
      %228 = math.tanh %227 : vector<8x32xf32>
      %229 = arith.mulf %222, %228 : vector<8x32xf32>
      %230 = arith.addi %3, %c6_i32 : i32
      %231 = vector.broadcast %230 : i32 to vector<8x1xi32>
      %232 = arith.cmpi slt, %231, %12 : vector<8x1xi32>
      %233 = vector.shape_cast %232 : vector<8x1xi1> to vector<8x1xi1>
      %234 = vector.broadcast %233 : vector<8x1xi1> to vector<8x32xi1>
      %235 = arith.select %234, %229, %203 : vector<8x32xi1>, vector<8x32xf32>
      %236 = vector.shape_cast %232 : vector<8x1xi1> to vector<8x1xi1>
      %237 = vector.broadcast %236 : vector<8x1xi1> to vector<8x32xi1>
      %238 = arith.select %237, %227, %206 : vector<8x32xi1>, vector<8x32xf32>
      %c7_i32 = arith.constant 7 : i32
      %239 = arith.index_cast %c7_i32 : i32 to index
      %c0_40 = arith.constant 0 : index
      %c0_41 = arith.constant 0 : index
      %240 = vector.load %arg3[%239, %c0_40, %c0_41] : memref<8x8x128xbf16, #tpu.memory_space<vmem>>, vector<1x8x128xbf16>
      %241 = vector.shape_cast %240 : vector<1x8x128xbf16> to vector<8x128xbf16>
      %242 = arith.extf %241 : vector<8x128xbf16> to vector<8x128xf32>
      %243 = arith.truncf %235 : vector<8x32xf32> to vector<8x32xbf16>
      %cst_42 = arith.constant dense<0.000000e+00> : vector<8x128xf32>
      %244 = tpu.matmul %243, %11, %cst_42 {dimension_numbers = #tpu.dot_dimension_numbers<[1], [0], [0], [1], [0, 0, 1, 1], [], []>} : vector<8x32xbf16>, vector<32x128xbf16>, vector<8x128xf32> -> vector<8x128xf32>
      %245 = arith.addf %242, %244 : vector<8x128xf32>
      %246 = vector.extract_strided_slice %245 {offsets = [0, 0], sizes = [8, 96], strides = [1, 1]} : vector<8x128xf32> to vector<8x96xf32>
      %247 = arith.negf %246 : vector<8x96xf32>
      %248 = math.exp %247 : vector<8x96xf32>
      %cst_43 = arith.constant 1.000000e+00 : f32
      %249 = vector.broadcast %cst_43 : f32 to vector<8x96xf32>
      %250 = arith.addf %249, %248 : vector<8x96xf32>
      %251 = arith.divf %249, %250 : vector<8x96xf32>
      %252 = vector.extract_strided_slice %251 {offsets = [0, 0], sizes = [8, 32], strides = [1, 1]} : vector<8x96xf32> to vector<8x32xf32>
      %253 = vector.extract_strided_slice %251 {offsets = [0, 32], sizes = [8, 32], strides = [1, 1]} : vector<8x96xf32> to vector<8x32xf32>
      %254 = vector.extract_strided_slice %251 {offsets = [0, 64], sizes = [8, 32], strides = [1, 1]} : vector<8x96xf32> to vector<8x32xf32>
      %255 = vector.extract_strided_slice %245 {offsets = [0, 96], sizes = [8, 32], strides = [1, 1]} : vector<8x128xf32> to vector<8x32xf32>
      %256 = math.tanh %255 : vector<8x32xf32>
      %257 = arith.mulf %253, %238 : vector<8x32xf32>
      %258 = arith.mulf %252, %256 : vector<8x32xf32>
      %259 = arith.addf %257, %258 : vector<8x32xf32>
      %260 = math.tanh %259 : vector<8x32xf32>
      %261 = arith.mulf %254, %260 : vector<8x32xf32>
      %262 = arith.addi %3, %c7_i32 : i32
      %263 = vector.broadcast %262 : i32 to vector<8x1xi32>
      %264 = arith.cmpi slt, %263, %12 : vector<8x1xi32>
      %265 = vector.shape_cast %264 : vector<8x1xi1> to vector<8x1xi1>
      %266 = vector.broadcast %265 : vector<8x1xi1> to vector<8x32xi1>
      %267 = arith.select %266, %261, %235 : vector<8x32xi1>, vector<8x32xf32>
      %268 = vector.shape_cast %264 : vector<8x1xi1> to vector<8x1xi1>
      %269 = vector.broadcast %268 : vector<8x1xi1> to vector<8x32xi1>
      %270 = arith.select %269, %259, %238 : vector<8x32xi1>, vector<8x32xf32>
      %c8_i32_44 = arith.constant 8 : i32
      %c0_45 = arith.constant 0 : index
      %c0_46 = arith.constant 0 : index
      %271 = vector.load %arg9[%c0_45, %c0_46] : memref<8x32xf32, #tpu.memory_space<vmem>>, vector<8x32xf32>
      tpu.vector_store %arg9[%c0_45, %c0_46], %267 {strides = array<i32>} : memref<8x32xf32, #tpu.memory_space<vmem>>, vector<8x32xf32>,
      %c0_47 = arith.constant 0 : index
      %c0_48 = arith.constant 0 : index
      %272 = vector.load %arg10[%c0_47, %c0_48] : memref<8x32xf32, #tpu.memory_space<vmem>>, vector<8x32xf32>
      tpu.vector_store %arg10[%c0_47, %c0_48], %270 {strides = array<i32>} : memref<8x32xf32, #tpu.memory_space<vmem>>, vector<8x32xf32>,
    } else {
    }
    %c0_i32_2 = arith.constant 0 : i32
    %8 = arith.cmpi eq, %arg1, %c0_i32_2 : i32
    %9 = arith.extui %8 : i1 to i32
    %c0_i32_3 = arith.constant 0 : i32
    %10 = arith.cmpi ne, %9, %c0_i32_3 : i32
    scf.if %10 {
      %c0_4 = arith.constant 0 : index
      %c0_5 = arith.constant 0 : index
      %11 = vector.load %arg9[%c0_4, %c0_5] : memref<8x32xf32, #tpu.memory_space<vmem>>, vector<8x32xf32>
      %c0_6 = arith.constant 0 : index
      %c0_7 = arith.constant 0 : index
      %12 = vector.load %arg6[%c0_6, %c0_7] : memref<8x32xf32, #tpu.memory_space<vmem>>, vector<8x32xf32>
      tpu.vector_store %arg6[%c0_6, %c0_7], %11 {strides = array<i32>} : memref<8x32xf32, #tpu.memory_space<vmem>>, vector<8x32xf32>,
    } else {
    }
    return
  }
  func.func @transform_0(%arg0: i32, %arg1: i32, %arg2: memref<1xi32, #tpu.memory_space<smem>>) -> (i32, i32, i32) {
    %c0_i32 = arith.constant 0 : i32
    %c0_i32_0 = arith.constant 0 : i32
    return %arg1, %arg0, %c0_i32 : i32, i32, i32
  }
  func.func @transform_1(%arg0: i32, %arg1: i32, %arg2: memref<1xi32, #tpu.memory_space<smem>>) -> (i32, i32) {
    %c0_i32 = arith.constant 0 : i32
    %c0_i32_0 = arith.constant 0 : i32
    return %arg0, %c0_i32 : i32, i32
  }
  func.func @transform_3(%arg0: i32, %arg1: i32, %arg2: memref<1xi32, #tpu.memory_space<smem>>) -> (i32, i32) {
    %c0_i32 = arith.constant 0 : i32
    %c0_i32_0 = arith.constant 0 : i32
    return %arg0, %c0_i32 : i32, i32
  }
}

</mosaic_0001>

<bundles_post_ra>
// kernel: tpu_custom_call.1
= control target key start
LH: loop header
LB: loop body
LE: loop exit
PB: predicated region body
PF: predicated region fallthrough
CT: control target
= control target key end

     0   :  { %10 = vsyncpa [#allocation9], 0  ;;  %s1272_s0 = inlined_call_operand.<no memory space> [shape: s32[1], index: 0, kind: input, shape index: {}]   ;;  %s1273_s1 = inlined_call_operand.hbm [shape: bf16[8,8,128], index: 1, kind: input, shape index: {}]   ;;  %s1274_s2 = inlined_call_operand.vmem [shape: s32[8,1], index: 2, kind: input, shape index: {}]   ;;  %s1275_s3 = inlined_call_operand.vmem [shape: bf16[32,128], index: 3, kind: input, shape index: {}]   ;;  %s1276_s4 = inlined_call_operand.hbm [shape: f32[8,32], index: 4, kind: output, shape index: {}]  }
   0x1   :  { %11 = vsyncpa [#allocation10], 0  ;;  %s1067_s15 = smov [#allocation8]   ;;  %s1017_s19 = scalar_lea.hbm %s1273_s1, 512 }
   0x2   :  { %s17_s16 = sshll.u32 %s1067_s15, 4  ;;  %p1018_p0 = scmp.ne.s32.totalorder %s1273_s1, %s1017_s19  ;;  %s18_s16 = int_to_ptr.vmem [resolvable:$true] %s17_s16 }
   0x3   :  { %p1021_p1 = scmp.lt.u32.totalorder %s1017_s19, %s1273_s1 }
   0x5   :  { %p1023_p2 = pnand %p1021_p1, %p1018_p0 }
   0x7   :  { %1026 = shalt.err (!%p1023_p2)
}
   0x8   :  { %s1027_s24 = scalar_lea.vmem %s18_s16, 512  ;;  %p1032_p4 = scmp.lt.s32.totalorder %s18_s16, %s18_s16 }
   0x9   :  { %p1028_p3 = scmp.ne.s32.totalorder %s18_s16, %s1027_s24  ;;  %p1033_p5 = scmp.lt.s32.totalorder %s1027_s24, %s1027_s24 }
   0xb   :  { %p1034_p6 = por %p1033_p5, %p1032_p4 }
   0xd   :  { %p1035_p7 = pnand %p1034_p6, %p1028_p3 }
   0xf   :  { %1038 = shalt.err (!%p1035_p7)
}
  0x10   :  { %s1068_s25 = smov 64   ;;  %s1069_s26 = smov 4  }
  0x11   :  { %23 = dma.hbm_to_vmem [thread:$0]  %s1273_s1, 512, %s18_s16, [#allocation9], %s1068_s25, %s1068_s25, %s1069_s26  }
  0x12   :  { %1061 = dma.done.wait [#allocation9], 512  }
  0x13   :  { %1062 = vsyncadd [#allocation9], 4294966784  ;;  %v66_v0 = vld [vmem:[%s1275_s3] sm:$0xff]  ;;  %v68_v1 = vld [vmem:[%s1275_s3 + $0x8] sm:$0xff] }
  0x14   :  { %67 = vst [vmem:[#allocation2] sm:$0xff] %v66_v0  ;;  %69 = vst [vmem:[#allocation2 + $0x8] sm:$0xff] %v68_v1 }
  0x15   :  { %77 = vsyncadd [#allocation3], 256 }
  0x16   :  { %1063 = dma.done.wait [#allocation3], 256 }
  0x17   :  { %1064 = vsyncadd [#allocation3], 4294967040  ;;  %vm82_vm0 = vcmask 261120   ;;  %v1070_v2 = vmov 0.0   ;;  %p826_p8 = scmp.le.s32.totalorder %s1272_s0, 0 }
  0x18   :  { %83 = vst.msk [vmem:[#allocation4] sm:$0xff] %vm82_vm0, %v1070_v2  ;;  %84 = vst.msk [vmem:[#allocation5] sm:$0xff] %vm82_vm0, %v1070_v2  ;;  %v1071_v4 = vmov (!%p826_p8), 0.0   ;;  %vm1072_vm1 = vmmov (!%p826_p8), 0   ;;  %v96_v8 = vld [vmem:[#allocation8] sm:$0xff] (!%p826_p8)   ;;  %v1073_v15 = vmov (!%p826_p8), 0  }
  0x19   :  { %90 = sbr.rel (%p826_p8) target bundleno = 5674 (0x162a), region = 55  ;;  %876 = vmatprep.subr.bf16.mxu0 (!%p826_p8), %v1071_v4  ;;  %880 = vmatprep.mubr.msk.bf16.mxu0 (!%p826_p8), %vm1072_vm1, %v1071_v4  ;;  %v97_v9 = vunpack.c.l.bf16 (!%p826_p8), %v96_v8  ;;  %s1074_s0 = smov (!%p826_p8), 32   ;;  %v1158_v21 = vld [vmem:[%s1274_s2] sm:$0xff] (!%p826_p8)  ;;  %v187_v38 = vunpack.c.h.bf16 (!%p826_p8), %v96_v8  ;;  %v271_v63 = vld [vmem:[#allocation8 + $0x8] sm:$0xff] (!%p826_p8)  }
  0x1a   :  { %884 = vmatprep.subr.bf16.mxu1 (!%p826_p8), %v1071_v4  ;;  %888 = vmatprep.mubr.msk.bf16.mxu1 (!%p826_p8), %vm1072_vm1, %v1071_v4  ;;  %vm829_vm2 = vcmp.gt.s32.totalorder (!%p826_p8), %v1158_v21, 0  ;;  %s1075_s9 = smov (!%p826_p8), 64   ;;  %vm832_vm4 = vcmp.gt.s32.totalorder (!%p826_p8), %v1158_v21, 1  ;;  %v272_v0 = vunpack.c.l.bf16 (!%p826_p8), %v271_v63  ;;  %vm835_vm6 = vcmp.gt.s32.totalorder (!%p826_p8), %v1158_v21, 2  ;;  %s1076_s2 = smov (!%p826_p8), 96  }
  0x1b   :  { %v1126_v3 = vld [vmem:[#allocation2] sm:$0xff] (!%p826_p8)  ;;  %v1134_v6 = vld [vmem:[#allocation2 + $0x8] sm:$0xff] (!%p826_p8)  ;;  %951 = vset.pattern.permute.xlu1 (!%p826_p8), %v1073_v15  ;;  %952 = vset.pattern.permute.xlu0 (!%p826_p8), %v1073_v15  ;;  %v174_v25 = vsel (!%p826_p8), %vm829_vm2, 1, %v1073_v15  ;;  %v263_v45 = vsel (!%p826_p8), %vm832_vm4, 1, %v1073_v15  ;;  %vm838_vm8 = vcmp.gt.s32.totalorder (!%p826_p8), %v1158_v21, 3  ;;  %vm841_vm10 = vcmp.gt.s32.totalorder (!%p826_p8), %v1158_v21, 4 }
  0x1c   :  { %877 = vmatpush3.bf16.msra.mxu0 (!%p826_p8), %v1126_v3  ;;  %885 = vmatpush3.bf16.msra.mxu1 (!%p826_p8), %v1126_v3  ;;  %vm844_vm12 = vcmp.gt.s32.totalorder (!%p826_p8), %v1158_v21, 5  ;;  %vm847_vm14 = vcmp.gt.s32.totalorder (!%p826_p8), %v1158_v21, 6 }
  0x1d   :  { %878 = vmatprep.subr.bf16.mxu0 (!%p826_p8), %v1071_v4  ;;  %886 = vmatprep.subr.bf16.mxu1 (!%p826_p8), %v1071_v4 }
  0x1f   :  { %v94_v5 = vld [vmem:[#allocation4] sm:$0xff] (!%p826_p8)  ;;  %v95_v17 = vld [vmem:[#allocation5] sm:$0xff] (!%p826_p8) }
  0x20   :  { %v98_v7 = vpack.c.bf16 %v94_v5, %v94_v5  ;;  %879 = vmatpush3.bf16.msra.mxu0 %v1134_v6  ;;  %887 = vmatpush3.bf16.msra.mxu1 %v1134_v6 }
  0x21   :  { %892 = vmatprep.subr.bf16.mxu0 %v1071_v4  ;;  %900 = vmatprep.subr.bf16.mxu1 %v1071_v4 }
  0x23   :  { %881 = vmatmul.mubr.msk.bf16.vlgmr.msra.gmra.mrb[0].mxu0 %vm82_vm0, %v98_v7 }
  0x24   :  { %893 = vmatpush3.bf16.msra.mxu0 %v1126_v3  ;;  %896 = vmatprep.mubr.msk.bf16.mxu0 %vm1072_vm1, %v1071_v4 }
  0x25   :  { %894 = vmatprep.subr.bf16.mxu0 %v1071_v4 }
  0x28   :  { %895 = vmatpush3.bf16.msra.mxu0 %v1134_v6 }
  0x29   :  { %908 = vmatprep.subr.bf16.mxu0 %v1071_v4 }
  0xf6   :  { %v137_v10 = vpop.f32.mrb[0].mxu0 }
  0xf7   :  { %v143_v11 = vadd.f32 %v137_v10, %v97_v9  ;;  %v882_v12 = vpop.f32.mrb[1].mxu0  ;;  %v348_v10 = vsel %vm835_vm6, 1, %v1073_v15 }
  0xf8   :  { %v140_v13 = vpop.f32.mrb[2].mxu0 }
  0xf9   :  { %953 = vtanh.f32 %v143_v11  ;;  %v883_v14 = vpop.f32.mrb[3].mxu0  ;;  %v828_v18 = vmul.f32 -1.442695, %v143_v11 }
  0xfb   :  { %955 = vpow2.f32 %v828_v18 }
 0x103   :  { %v954_v16 = vpop.eup %953 }
 0x104   :  { %157 = vrot.lane.b32.xlu0 %v954_v16, %s1074_s0 }
 0x105   :  { %v956_v19 = vpop.eup %955 }
 0x106   :  { %v147_v20 = vadd.f32 1.0, %v956_v19 }
 0x108   :  { %152 = vrot.lane.b32.xlu0 %v95_v17, %s1074_s0  ;;  %957 = vrcp.f32 %v147_v20 }
 0x112   :  { %v958_v22 = vpop.eup %957 }
 0x176   :  { %v158_v23 = vpop.permute.xlu0 %157 }
 0x177   :  { %v160_v24 = vmul.f32 %v958_v22, %v158_v23 }
 0x179   :  { %162 = vrot.lane.b32.xlu1 %v160_v24, %s1074_s0 }
 0x17a   :  { %v153_v26 = vpop.permute.xlu0 %152 }
 0x17b   :  { %v155_v27 = vmul.f32 %v958_v22, %v153_v26 }
 0x17d   :  { %176 = vperm.xlu1 %951, %v174_v25  }
 0x181   :  { %180 = vrot.lane.b32.xlu1 %v94_v5, %s1075_s9 }
 0x1eb   :  { %v163_v28 = vpop.permute.xlu1 %162 }
 0x1ec   :  { %v165_v29 = vadd.f32 %v163_v28, %v155_v27 }
 0x1ee   :  { %959 = vtanh.f32 %v165_v29 }
 0x1f8   :  { %v960_v30 = vpop.eup %959 }
 0x1f9   :  { %168 = vrot.lane.b32.xlu0 %v960_v30, %s1074_s0  ;;  %v357_v30 = vunpack.c.h.bf16 %v271_v63  ;;  %v518_v63 = vsel %vm841_vm10, 1, %v1073_v15 }
 0x1fc   :  { %v177_v31 = vpop.permute.xlu1 %176 }
 0x1fd   :  { %vm178_vm3 = vcmp.eq.s32.totalorder %v177_v31, 1 }
 0x1fe   :  { %v184_v52 = vsel %vm178_vm3, %v165_v29, %v153_v26 }
 0x200   :  { %v181_v33 = vpop.permute.xlu1 %180 }
 0x26b   :  { %v169_v32 = vpop.permute.xlu0 %168 }
 0x26c   :  { %v171_v34 = vmul.f32 %v958_v22, %v169_v32 }
 0x26e   :  { %v183_v35 = vsel %vm178_vm3, %v171_v34, %v181_v33 }
 0x26f   :  { %v188_v36 = vpack.c.bf16 %v183_v35, %v183_v35 }
 0x271   :  { %190 = vrot.lane.b32.xlu0 %v188_v36, %s1075_s9 }
 0x2e3   :  { %v191_v37 = vpop.permute.xlu0 %190 }
 0x2e4   :  { %889 = vmatmul.mubr.msk.bf16.vlgmr.msra.gmra.mrb[0].mxu1 %vm82_vm0, %v191_v37  ;;  %v433_v37 = vsel %vm838_vm8, 1, %v1073_v15 }
 0x2e5   :  { %901 = vmatpush3.bf16.msra.mxu1 %v1126_v3  ;;  %904 = vmatprep.mubr.msk.bf16.mxu1 %vm1072_vm1, %v1071_v4 }
 0x2e6   :  { %902 = vmatprep.subr.bf16.mxu1 %v1071_v4 }
 0x2e9   :  { %903 = vmatpush3.bf16.msra.mxu1 %v1134_v6 }
 0x2ea   :  { %916 = vmatprep.subr.bf16.mxu1 %v1071_v4 }
 0x3b7   :  { %v229_v39 = vpop.f32.mrb[0].mxu1 }
 0x3b8   :  { %v235_v40 = vadd.f32 %v229_v39, %v187_v38  ;;  %v890_v41 = vpop.f32.mrb[1].mxu1 }
 0x3b9   :  { %v232_v42 = vpop.f32.mrb[2].mxu1 }
 0x3ba   :  { %961 = vtanh.f32 %v235_v40  ;;  %v891_v43 = vpop.f32.mrb[3].mxu1  ;;  %v831_v46 = vmul.f32 -1.442695, %v235_v40 }
 0x3bc   :  { %963 = vpow2.f32 %v831_v46 }
 0x3c4   :  { %v962_v44 = vpop.eup %961 }
 0x3c5   :  { %245 = vrot.lane.b32.xlu1 %v962_v44, %s1074_s0 }
 0x3c6   :  { %v964_v47 = vpop.eup %963 }
 0x3c7   :  { %v239_v48 = vadd.f32 1.0, %v964_v47 }
 0x3c9   :  { %265 = vperm.xlu1 %951, %v263_v45   ;;  %965 = vrcp.f32 %v239_v48 }
 0x3d3   :  { %v966_v49 = vpop.eup %965 }
 0x3d4   :  { %v243_v53 = vmul.f32 %v966_v49, %v184_v52 }
 0x437   :  { %v246_v50 = vpop.permute.xlu1 %245 }
 0x438   :  { %v248_v51 = vmul.f32 %v966_v49, %v246_v50 }
 0x43a   :  { %250 = vrot.lane.b32.xlu0 %v248_v51, %s1074_s0 }
 0x448   :  { %v266_v57 = vpop.permute.xlu1 %265 }
 0x449   :  { %vm267_vm5 = vcmp.eq.s32.totalorder %v266_v57, 1 }
 0x4ac   :  { %v251_v54 = vpop.permute.xlu0 %250 }
 0x4ad   :  { %v253_v55 = vadd.f32 %v251_v54, %v243_v53 }
 0x4af   :  { %967 = vtanh.f32 %v253_v55  ;;  %v269_v18 = vsel %vm267_vm5, %v253_v55, %v184_v52  ;;  %v441_v55 = vld [vmem:[#allocation8 + $0x10] sm:$0xff]  }
 0x4b9   :  { %v968_v56 = vpop.eup %967 }
 0x4ba   :  { %256 = vrot.lane.b32.xlu0 %v968_v56, %s1074_s0  ;;  %v442_v56 = vunpack.c.l.bf16 %v441_v55 }
 0x52c   :  { %v257_v58 = vpop.permute.xlu0 %256 }
 0x52d   :  { %v259_v59 = vmul.f32 %v966_v49, %v257_v58 }
 0x52f   :  { %v268_v60 = vsel %vm267_vm5, %v259_v59, %v183_v35 }
 0x530   :  { %v273_v61 = vpack.c.bf16 %v268_v60, %v268_v60 }
 0x532   :  { %275 = vrot.lane.b32.xlu1 %v273_v61, %s1075_s9 }
 0x5a4   :  { %v276_v62 = vpop.permute.xlu1 %275 }
 0x5a5   :  { %897 = vmatmul.mubr.msk.bf16.vlgmr.msra.gmra.mrb[4].mxu0 %vm82_vm0, %v276_v62 }
 0x5a6   :  { %909 = vmatpush3.bf16.msra.mxu0 %v1126_v3  ;;  %912 = vmatprep.mubr.msk.bf16.mxu0 %vm1072_vm1, %v1071_v4 }
 0x5a7   :  { %910 = vmatprep.subr.bf16.mxu0 %v1071_v4 }
 0x5aa   :  { %911 = vmatpush3.bf16.msra.mxu0 %v1134_v6 }
 0x5ab   :  { %924 = vmatprep.subr.bf16.mxu0 %v1071_v4 }
 0x678   :  { %v314_v1 = vpop.f32.mrb[4].mxu0 }
 0x679   :  { %v320_v2 = vadd.f32 %v314_v1, %v272_v0  ;;  %v898_v5 = vpop.f32.mrb[5].mxu0 }
 0x67a   :  { %v317_v7 = vpop.f32.mrb[6].mxu0 }
 0x67b   :  { %969 = vtanh.f32 %v320_v2  ;;  %v899_v8 = vpop.f32.mrb[7].mxu0  ;;  %v834_v11 = vmul.f32 -1.442695, %v320_v2 }
 0x67d   :  { %971 = vpow2.f32 %v834_v11 }
 0x685   :  { %v970_v9 = vpop.eup %969 }
 0x686   :  { %330 = vrot.lane.b32.xlu0 %v970_v9, %s1074_s0 }
 0x687   :  { %v972_v12 = vpop.eup %971 }
 0x688   :  { %v324_v13 = vadd.f32 1.0, %v972_v12 }
 0x68a   :  { %350 = vperm.xlu0 %952, %v348_v10   ;;  %973 = vrcp.f32 %v324_v13 }
 0x694   :  { %v974_v14 = vpop.eup %973 }
 0x695   :  { %v328_v19 = vmul.f32 %v974_v14, %v269_v18 }
 0x6f8   :  { %v331_v16 = vpop.permute.xlu0 %330 }
 0x6f9   :  { %v333_v17 = vmul.f32 %v974_v14, %v331_v16 }
 0x6fb   :  { %335 = vrot.lane.b32.xlu1 %v333_v17, %s1074_s0 }
 0x709   :  { %v351_v24 = vpop.permute.xlu0 %350 }
 0x70a   :  { %vm352_vm7 = vcmp.eq.s32.totalorder %v351_v24, 1 }
 0x76d   :  { %v336_v20 = vpop.permute.xlu1 %335 }
 0x76e   :  { %v338_v22 = vadd.f32 %v336_v20, %v328_v19 }
 0x770   :  { %975 = vtanh.f32 %v338_v22  ;;  %v354_v44 = vsel %vm352_vm7, %v338_v22, %v269_v18  ;;  %v527_v22 = vunpack.c.h.bf16 %v441_v55 }
 0x77a   :  { %v976_v23 = vpop.eup %975 }
 0x77b   :  { %341 = vrot.lane.b32.xlu1 %v976_v23, %s1074_s0 }
 0x7ed   :  { %v342_v25 = vpop.permute.xlu1 %341 }
 0x7ee   :  { %v344_v26 = vmul.f32 %v974_v14, %v342_v25 }
 0x7f0   :  { %v353_v27 = vsel %vm352_vm7, %v344_v26, %v268_v60 }
 0x7f1   :  { %v358_v28 = vpack.c.bf16 %v353_v27, %v353_v27 }
 0x7f3   :  { %360 = vrot.lane.b32.xlu1 %v358_v28, %s1075_s9 }
 0x865   :  { %v361_v29 = vpop.permute.xlu1 %360 }
 0x866   :  { %905 = vmatmul.mubr.msk.bf16.vlgmr.msra.gmra.mrb[4].mxu1 %vm82_vm0, %v361_v29 }
 0x867   :  { %917 = vmatpush3.bf16.msra.mxu1 %v1126_v3  ;;  %920 = vmatprep.mubr.msk.bf16.mxu1 %vm1072_vm1, %v1071_v4 }
 0x868   :  { %918 = vmatprep.subr.bf16.mxu1 %v1071_v4 }
 0x86b   :  { %919 = vmatpush3.bf16.msra.mxu1 %v1134_v6 }
 0x86c   :  { %932 = vmatprep.subr.bf16.mxu1 %v1071_v4 }
 0x939   :  { %v399_v31 = vpop.f32.mrb[4].mxu1 }
 0x93a   :  { %v405_v32 = vadd.f32 %v399_v31, %v357_v30  ;;  %v906_v33 = vpop.f32.mrb[5].mxu1 }
 0x93b   :  { %v402_v34 = vpop.f32.mrb[6].mxu1 }
 0x93c   :  { %977 = vtanh.f32 %v405_v32  ;;  %v907_v35 = vpop.f32.mrb[7].mxu1  ;;  %v837_v38 = vmul.f32 -1.442695, %v405_v32 }
 0x93e   :  { %979 = vpow2.f32 %v837_v38 }
 0x946   :  { %v978_v36 = vpop.eup %977 }
 0x947   :  { %415 = vrot.lane.b32.xlu0 %v978_v36, %s1074_s0 }
 0x948   :  { %v980_v39 = vpop.eup %979 }
 0x949   :  { %v409_v40 = vadd.f32 1.0, %v980_v39 }
 0x94b   :  { %435 = vperm.xlu0 %952, %v433_v37   ;;  %981 = vrcp.f32 %v409_v40 }
 0x955   :  { %v982_v41 = vpop.eup %981 }
 0x956   :  { %v413_v45 = vmul.f32 %v982_v41, %v354_v44 }
 0x9b9   :  { %v416_v42 = vpop.permute.xlu0 %415 }
 0x9ba   :  { %v418_v43 = vmul.f32 %v982_v41, %v416_v42 }
 0x9bc   :  { %420 = vrot.lane.b32.xlu1 %v418_v43, %s1074_s0 }
 0x9ca   :  { %v436_v49 = vpop.permute.xlu0 %435 }
 0x9cb   :  { %vm437_vm9 = vcmp.eq.s32.totalorder %v436_v49, 1 }
 0xa2e   :  { %v421_v46 = vpop.permute.xlu1 %420 }
 0xa2f   :  { %v423_v47 = vadd.f32 %v421_v46, %v413_v45 }
 0xa31   :  { %983 = vtanh.f32 %v423_v47  ;;  %v439_v9 = vsel %vm437_vm9, %v423_v47, %v354_v44  ;;  %v611_v44 = vld [vmem:[#allocation8 + $0x18] sm:$0xff]  }
 0xa32   :  { %v612_v45 = vunpack.c.l.bf16 %v611_v44 }
 0xa3b   :  { %v984_v48 = vpop.eup %983 }
 0xa3c   :  { %426 = vrot.lane.b32.xlu1 %v984_v48, %s1074_s0 }
 0xaae   :  { %v427_v50 = vpop.permute.xlu1 %426 }
 0xaaf   :  { %v429_v51 = vmul.f32 %v982_v41, %v427_v50 }
 0xab1   :  { %v438_v52 = vsel %vm437_vm9, %v429_v51, %v353_v27 }
 0xab2   :  { %v443_v53 = vpack.c.bf16 %v438_v52, %v438_v52 }
 0xab4   :  { %445 = vrot.lane.b32.xlu0 %v443_v53, %s1075_s9 }
 0xb26   :  { %v446_v54 = vpop.permute.xlu0 %445 }
 0xb27   :  { %913 = vmatmul.mubr.msk.bf16.vlgmr.msra.gmra.mrb[8].mxu0 %vm82_vm0, %v446_v54 }
 0xb28   :  { %925 = vmatpush3.bf16.msra.mxu0 %v1126_v3  ;;  %928 = vmatprep.mubr.msk.bf16.mxu0 %vm1072_vm1, %v1071_v4 }
 0xb29   :  { %926 = vmatprep.subr.bf16.mxu0 %v1071_v4 }
 0xb2c   :  { %927 = vmatpush3.bf16.msra.mxu0 %v1134_v6 }
 0xbfa   :  { %v484_v57 = vpop.f32.mrb[8].mxu0 }
 0xbfb   :  { %v490_v58 = vadd.f32 %v484_v57, %v442_v56  ;;  %v914_v59 = vpop.f32.mrb[9].mxu0 }
 0xbfc   :  { %v487_v60 = vpop.f32.mrb[10].mxu0 }
 0xbfd   :  { %985 = vtanh.f32 %v490_v58  ;;  %v915_v61 = vpop.f32.mrb[11].mxu0  ;;  %v840_v0 = vmul.f32 -1.442695, %v490_v58 }
 0xbff   :  { %987 = vpow2.f32 %v840_v0 }
 0xc07   :  { %v986_v62 = vpop.eup %985 }
 0xc08   :  { %500 = vrot.lane.b32.xlu1 %v986_v62, %s1074_s0 }
 0xc09   :  { %v988_v1 = vpop.eup %987 }
 0xc0a   :  { %v494_v2 = vadd.f32 1.0, %v988_v1 }
 0xc0c   :  { %520 = vperm.xlu1 %951, %v518_v63   ;;  %989 = vrcp.f32 %v494_v2 }
 0xc16   :  { %v990_v5 = vpop.eup %989 }
 0xc17   :  { %v498_v10 = vmul.f32 %v990_v5, %v439_v9 }
 0xc7a   :  { %v501_v7 = vpop.permute.xlu1 %500 }
 0xc7b   :  { %v503_v8 = vmul.f32 %v990_v5, %v501_v7 }
 0xc7d   :  { %505 = vrot.lane.b32.xlu0 %v503_v8, %s1074_s0 }
 0xc8b   :  { %v521_v14 = vpop.permute.xlu1 %520 }
 0xc8c   :  { %vm522_vm11 = vcmp.eq.s32.totalorder %v521_v14, 1 }
 0xcef   :  { %v506_v11 = vpop.permute.xlu0 %505 }
 0xcf0   :  { %v508_v12 = vadd.f32 %v506_v11, %v498_v10 }
 0xcf2   :  { %991 = vtanh.f32 %v508_v12  ;;  %v524_v33 = vsel %vm522_vm11, %v508_v12, %v439_v9  ;;  %v697_v9 = vunpack.c.h.bf16 %v611_v44 }
 0xcfc   :  { %v992_v13 = vpop.eup %991 }
 0xcfd   :  { %511 = vrot.lane.b32.xlu0 %v992_v13, %s1074_s0 }
 0xd6f   :  { %v512_v16 = vpop.permute.xlu0 %511 }
 0xd70   :  { %v514_v17 = vmul.f32 %v990_v5, %v512_v16 }
 0xd72   :  { %v523_v18 = vsel %vm522_vm11, %v514_v17, %v438_v52  ;;  %v688_v52 = vsel %vm847_vm14, 1, %v1073_v15 }
 0xd73   :  { %v528_v19 = vpack.c.bf16 %v523_v18, %v523_v18 }
 0xd75   :  { %530 = vrot.lane.b32.xlu1 %v528_v19, %s1075_s9 }
 0xde7   :  { %v531_v20 = vpop.permute.xlu1 %530 }
 0xde8   :  { %921 = vmatmul.mubr.msk.bf16.vlgmr.msra.gmra.mrb[8].mxu1 %vm82_vm0, %v531_v20 }
 0xde9   :  { %933 = vmatpush3.bf16.msra.mxu1 %v1126_v3  ;;  %936 = vmatprep.mubr.msk.bf16.mxu1 %vm1072_vm1, %v1071_v4  ;;  %v603_v3 = vsel %vm844_vm12, 1, %v1073_v15  ;;  %vm850_vm1 = vcmp.gt.s32.totalorder %v1158_v21, 7 }
 0xdea   :  { %934 = vmatprep.subr.bf16.mxu1 %v1071_v4  ;;  %v773_v17 = vsel %vm850_vm1, 1, %v1073_v15 }
 0xded   :  { %935 = vmatpush3.bf16.msra.mxu1 %v1134_v6 }
 0xebb   :  { %v569_v23 = vpop.f32.mrb[8].mxu1 }
 0xebc   :  { %v575_v24 = vadd.f32 %v569_v23, %v527_v22  ;;  %v922_v25 = vpop.f32.mrb[9].mxu1 }
 0xebd   :  { %v572_v26 = vpop.f32.mrb[10].mxu1 }
 0xebe   :  { %993 = vtanh.f32 %v575_v24  ;;  %v923_v27 = vpop.f32.mrb[11].mxu1  ;;  %v843_v29 = vmul.f32 -1.442695, %v575_v24 }
 0xec0   :  { %995 = vpow2.f32 %v843_v29 }
 0xec8   :  { %v994_v28 = vpop.eup %993 }
 0xec9   :  { %585 = vrot.lane.b32.xlu0 %v994_v28, %s1074_s0 }
 0xeca   :  { %v996_v4 = vpop.eup %995 }
 0xecb   :  { %v579_v30 = vadd.f32 1.0, %v996_v4 }
 0xecd   :  { %605 = vperm.xlu0 %952, %v603_v3   ;;  %997 = vrcp.f32 %v579_v30 }
 0xed7   :  { %v998_v6 = vpop.eup %997 }
 0xed8   :  { %v583_v34 = vmul.f32 %v998_v6, %v524_v33 }
 0xf3b   :  { %v586_v31 = vpop.permute.xlu0 %585 }
 0xf3c   :  { %v588_v32 = vmul.f32 %v998_v6, %v586_v31 }
 0xf3e   :  { %590 = vrot.lane.b32.xlu1 %v588_v32, %s1074_s0 }
 0xf4c   :  { %v606_v38 = vpop.permute.xlu0 %605 }
 0xf4d   :  { %vm607_vm13 = vcmp.eq.s32.totalorder %v606_v38, 1 }
 0xfb0   :  { %v591_v35 = vpop.permute.xlu1 %590 }
 0xfb1   :  { %v593_v36 = vadd.f32 %v591_v35, %v583_v34 }
 0xfb3   :  { %999 = vtanh.f32 %v593_v36  ;;  %v609_v59 = vsel %vm607_vm13, %v593_v36, %v524_v33 }
 0xfbd   :  { %v1000_v37 = vpop.eup %999 }
 0xfbe   :  { %596 = vrot.lane.b32.xlu1 %v1000_v37, %s1074_s0 }
0x1030   :  { %v597_v39 = vpop.permute.xlu1 %596 }
0x1031   :  { %v599_v40 = vmul.f32 %v998_v6, %v597_v39 }
0x1033   :  { %v608_v41 = vsel %vm607_vm13, %v599_v40, %v523_v18 }
0x1034   :  { %v613_v42 = vpack.c.bf16 %v608_v41, %v608_v41 }
0x1036   :  { %615 = vrot.lane.b32.xlu0 %v613_v42, %s1075_s9 }
0x10a8   :  { %v616_v43 = vpop.permute.xlu0 %615 }
0x10a9   :  { %929 = vmatmul.mubr.msk.bf16.vlgmr.msra.gmra.mrb[12].mxu0 %vm82_vm0, %v616_v43 }
0x117c   :  { %v654_v46 = vpop.f32.mrb[12].mxu0 }
0x117d   :  { %v660_v47 = vadd.f32 %v654_v46, %v612_v45  ;;  %v930_v48 = vpop.f32.mrb[13].mxu0 }
0x117e   :  { %v657_v49 = vpop.f32.mrb[14].mxu0 }
0x117f   :  { %1001 = vtanh.f32 %v660_v47  ;;  %v931_v50 = vpop.f32.mrb[15].mxu0  ;;  %v846_v53 = vmul.f32 -1.442695, %v660_v47 }
0x1181   :  { %1003 = vpow2.f32 %v846_v53 }
0x1189   :  { %v1002_v51 = vpop.eup %1001 }
0x118a   :  { %670 = vrot.lane.b32.xlu1 %v1002_v51, %s1074_s0 }
0x118b   :  { %v1004_v54 = vpop.eup %1003 }
0x118c   :  { %v664_v55 = vadd.f32 1.0, %v1004_v54 }
0x118e   :  { %690 = vperm.xlu1 %951, %v688_v52   ;;  %1005 = vrcp.f32 %v664_v55 }
0x1198   :  { %v1006_v56 = vpop.eup %1005 }
0x1199   :  { %v668_v60 = vmul.f32 %v1006_v56, %v609_v59 }
0x11fc   :  { %v671_v57 = vpop.permute.xlu1 %670 }
0x11fd   :  { %v673_v58 = vmul.f32 %v1006_v56, %v671_v57 }
0x11ff   :  { %675 = vrot.lane.b32.xlu0 %v673_v58, %s1074_s0 }
0x120d   :  { %v691_v0 = vpop.permute.xlu1 %690 }
0x120e   :  { %vm692_vm15 = vcmp.eq.s32.totalorder %v691_v0, 1 }
0x1271   :  { %v676_v61 = vpop.permute.xlu0 %675 }
0x1272   :  { %v678_v62 = vadd.f32 %v676_v61, %v668_v60 }
0x1274   :  { %1007 = vtanh.f32 %v678_v62  ;;  %v694_v25 = vsel %vm692_vm15, %v678_v62, %v609_v59 }
0x127e   :  { %v1008_v63 = vpop.eup %1007 }
0x127f   :  { %681 = vrot.lane.b32.xlu0 %v1008_v63, %s1074_s0 }
0x12f1   :  { %v682_v1 = vpop.permute.xlu0 %681 }
0x12f2   :  { %v684_v2 = vmul.f32 %v1006_v56, %v682_v1 }
0x12f4   :  { %v693_v5 = vsel %vm692_vm15, %v684_v2, %v608_v41 }
0x12f5   :  { %v698_v7 = vpack.c.bf16 %v693_v5, %v693_v5 }
0x12f7   :  { %700 = vrot.lane.b32.xlu1 %v698_v7, %s1075_s9 }
0x1369   :  { %v701_v8 = vpop.permute.xlu1 %700 }
0x136a   :  { %937 = vmatmul.mubr.msk.bf16.vlgmr.msra.gmra.mrb[12].mxu1 %vm82_vm0, %v701_v8 }
0x143d   :  { %v739_v10 = vpop.f32.mrb[12].mxu1 }
0x143e   :  { %v745_v11 = vadd.f32 %v739_v10, %v697_v9  ;;  %v938_v12 = vpop.f32.mrb[13].mxu1 }
0x143f   :  { %v742_v13 = vpop.f32.mrb[14].mxu1 }
0x1440   :  { %1009 = vtanh.f32 %v745_v11  ;;  %v939_v14 = vpop.f32.mrb[15].mxu1  ;;  %v849_v18 = vmul.f32 -1.442695, %v745_v11 }
0x1442   :  { %1011 = vpow2.f32 %v849_v18 }
0x144a   :  { %v1010_v16 = vpop.eup %1009 }
0x144b   :  { %755 = vrot.lane.b32.xlu0 %v1010_v16, %s1074_s0 }
0x144c   :  { %v1012_v19 = vpop.eup %1011 }
0x144d   :  { %v749_v20 = vadd.f32 1.0, %v1012_v19 }
0x144f   :  { %775 = vperm.xlu0 %952, %v773_v17   ;;  %1013 = vrcp.f32 %v749_v20 }
0x1459   :  { %v1014_v22 = vpop.eup %1013 }
0x145a   :  { %v753_v26 = vmul.f32 %v1014_v22, %v694_v25 }
0x14bd   :  { %v756_v23 = vpop.permute.xlu0 %755 }
0x14be   :  { %v758_v24 = vmul.f32 %v1014_v22, %v756_v23 }
0x14c0   :  { %760 = vrot.lane.b32.xlu1 %v758_v24, %s1074_s0 }
0x14ce   :  { %v776_v3 = vpop.permute.xlu0 %775 }
0x14cf   :  { %vm777_vm2 = vcmp.eq.s32.totalorder %v776_v3, 1 }
0x1532   :  { %v761_v21 = vpop.permute.xlu1 %760 }
0x1533   :  { %v763_v27 = vadd.f32 %v761_v21, %v753_v26 }
0x1535   :  { %1015 = vtanh.f32 %v763_v27  ;;  %v779_v15 = vsel %vm777_vm2, %v763_v27, %v694_v25 }
0x153f   :  { %v1016_v28 = vpop.eup %1015 }
0x1540   :  { %766 = vrot.lane.b32.xlu1 %v1016_v28, %s1074_s0 }
0x1544   :  { %786 = vrot.lane.b32.xlu1 %v779_v15, %s1076_s2 }
0x15b2   :  { %v767_v29 = vpop.permute.xlu1 %766 }
0x15b3   :  { %v769_v4 = vmul.f32 %v1014_v22, %v767_v29 }
0x15b5   :  { %v778_v30 = vsel %vm777_vm2, %v769_v4, %v693_v5 }
0x15b6   :  { %781 = vrot.lane.b32.xlu0 %v778_v30, %s1075_s9  ;;  %v787_v6 = vpop.permute.xlu1 %786 }
0x15b7   :  { %789 = vst.msk [vmem:[#allocation5] sm:$0xff] %vm82_vm0, %v787_v6 }
0x1628   :  { %v782_v31 = vpop.permute.xlu0 %781 }
0x1629   :  { %784 = vst.msk [vmem:[#allocation4] sm:$0xff] %vm82_vm0, %v782_v31 }
0x162a PF:  { %s1077_s10 = smov [#allocation11]  }
0x162b   :  { %s802_s11 = sshll.u32 %s1077_s10, 4  ;;  %s803_s11 = int_to_ptr.vmem [resolvable:$true] %s802_s11 }
0x162c   :  { %s1039_s12 = scalar_lea.vmem %s803_s11, 128  ;;  %p1044_p10 = scmp.lt.s32.totalorder %s803_s11, %s803_s11 }
0x162d   :  { %p1040_p9 = scmp.ne.s32.totalorder %s803_s11, %s1039_s12  ;;  %p1045_p11 = scmp.lt.s32.totalorder %s1039_s12, %s1039_s12 }
0x162f   :  { %p1046_p12 = por %p1045_p11, %p1044_p10 }
0x1630   :  { %v793_v32 = vld [vmem:[#allocation4] sm:$0xff] }
0x1631   :  { %795 = vst.msk [vmem:[#allocation11] sm:$0xff] %vm82_vm0, %v793_v32  ;;  %p1047_p13 = pnand %p1046_p12, %p1040_p9 }
0x1633   :  { %1050 = shalt.err (!%p1047_p13)
}
0x1634   :  { %s1051_s15 = scalar_lea.hbm %s1276_s4, 128 }
0x1635   :  { %p1052_p0 = scmp.ne.s32.totalorder %s1276_s4, %s1051_s15  ;;  %p1055_p1 = scmp.lt.u32.totalorder %s1051_s15, %s1276_s4 }
0x1637   :  { %p1057_p2 = pnand %p1055_p1, %p1052_p0 }
0x1639   :  { %1060 = shalt.err (!%p1057_p2)
}
0x163a   :  { %805 = dma.vmem_to_hbm [thread:$0]  %s803_s11, 128, %s1276_s4, [#allocation10]  }
0x163b   :  { %1065 = dma.done.wait [#allocation10], 128  }
0x163c   :  { %1066 = vsyncadd [#allocation10], 4294967168 }
0x163d   :  { %809 = vsyncpa [#allocation9], 1 }
0x163e   :  { %810 = vsyncpa [#allocation10], 1 }
0x163f   :  { %811 = vsyncmov [#allocation3] }
0x1642   :  { %s812_s22 = vpop.sfrf %811 }
0x1643   :  { %p851_p3 = scmp.ne.s32.totalorder %s812_s22, 0 }
0x1645   :  { %816 = shalt.err (%p851_p3)  }

</bundles_post_ra>
